<compile_context>
chip_gen: v6e
topology: v6e:2x2x1
jax: 0.10.0
libtpu: 0.0.40
codegen_flags: <defaults>
</compile_context>

<pallas_src>
import jax
import jax.numpy as jnp
from jax.experimental import pallas as pl
from jax.experimental.pallas import tpu as pltpu


def cbow_kernel(avg_ref, w_ref, b_ref, o_ref):
    # avg_ref: (Bp, Ep) bf16   w_ref: (Ep, TN) bf16
    # b_ref:   (1, TN)  f32    o_ref: (Bp, TN) f32
    acc = jnp.dot(avg_ref[...], w_ref[...],
                  preferred_element_type=jnp.float32)   # MXU, f32 accumulate
    o_ref[...] = acc + b_ref[...]                       # f32 epilogue (v5e-safe)


def _round_up(x, m):
    return x + (-x) % m


def _tpu_core_info():
    """Best-effort (num_tensorcores_per_chip, is_v7x); defaults to (1, False)."""
    try:
        dev = jax.devices()[0]
    except Exception:
        return 1, False
    kind = str(getattr(dev, "device_kind", "")).lower()
    if "v7" in kind:
        return 2, True
    # v4 / v5p megacore also shards 'parallel' grid axes across two cores.
    if "v4" in kind or "v5p" in kind:
        return 2, False
    return 1, False


_TILE_CANDIDATES = (4096, 2048, 1024, 512, 256, 128)


def _pick_tile(vp, num_tc):
    """Lane-dense vocab tile, generation-aware.

    Multi-TC parts: want an even number of steps per core and >= 2 steps/core
    so both cores stream with intra-core prefetch overlap.  Single-TC parts:
    just take the biggest tile that divides Vp (grid length 1 is fine).
    """
    if num_tc > 1:
        for cand in _TILE_CANDIDATES:
            if vp % cand == 0:
                steps = vp // cand
                if steps % num_tc == 0 and steps >= 2 * num_tc:
                    return cand
        for cand in _TILE_CANDIDATES:
            if vp % cand == 0 and (vp // cand) % num_tc == 0:
                return cand
    for cand in _TILE_CANDIDATES:
        if vp % cand == 0:
            return cand
    return vp


def prepare_cbow_params(linear_w, linear_b):
    """One-time (parameter-init-time) preparation of the linear layer params.

    Casts W to bf16, transposes to (E, V) and zero-pads to TPU-friendly
    extents.  Cache the returned tuple across forward calls so the dominant W
    HBM stream is only ever read in its final bf16 layout (~2 bytes/elem)
    instead of being rebuilt (read f32 + write bf16 + re-read bf16) per call.
    """
    V, E = linear_w.shape
    Ep = _round_up(E, 16)     # bf16 sublane pack on the streamed (Ep, tn) W tile
    Vp = _round_up(V, 128)    # lane-dense output -> unmasked vst
    w_t_bf = jnp.pad(linear_w.T.astype(jnp.bfloat16),
                     ((0, Ep - E), (0, Vp - V)))                    # (Ep, Vp)
    b2d = jnp.pad(linear_b.reshape(1, V).astype(jnp.float32),
                  ((0, 0), (0, Vp - V)))                            # (1, Vp)
    return w_t_bf, b2d, (E, V, Ep, Vp)


def cbow_forward(x, embedding_table, prepared, *, tn=None):
    """x: (B, C) int32; embedding_table: (V, E) f32; prepared from prepare_cbow_params."""
    B, C = x.shape
    w_t_bf, b2d, (E, V, Ep, Vp) = prepared

    # ---- Glue (plain JAX): data-dependent embedding gather + context mean ----
    emb = jnp.take(embedding_table, x, axis=0)          # (B, C, E) f32
    avg = jnp.mean(emb, axis=1)                         # (B, E)   f32

    # Pad the tiny LHS: B -> 16 (full bf16 sublane pack), E -> Ep (matches W^T).
    Bp = _round_up(B, 16)
    avg_bf = jnp.pad(avg.astype(jnp.bfloat16), ((0, Bp - B), (0, Ep - E)))

    num_tc, is_v7 = _tpu_core_info()
    if tn is None:
        tn = _pick_tile(Vp, num_tc)
    assert Vp % tn == 0, "padded vocab must be a multiple of the output tile"

    w_spec_kwargs = {}
    if is_v7:
        # v7x: per-step DMAs are short at 3.2 TB/s HBM; keep a third W
        # descriptor queued so the stream never stalls between steps.
        w_spec_kwargs["pipeline_mode"] = pl.Buffered(3)

    grid = (Vp // tn,)
    out = pl.pallas_call(
        cbow_kernel,
        out_shape=jax.ShapeDtypeStruct((Bp, Vp), jnp.float32),
        grid_spec=pltpu.PrefetchScalarGridSpec(
            num_scalar_prefetch=0,
            grid=grid,
            in_specs=[
                # Resident (Bp, Ep) LHS: same block every step (DMA'd once).
                pl.BlockSpec((Bp, Ep), lambda j: (0, 0)),
                # Streamed vocab tile of W^T — the only per-step-varying DMA.
                pl.BlockSpec((Ep, tn), lambda j: (0, j), **w_spec_kwargs),
                # Matching bias tile (f32).
                pl.BlockSpec((1, tn), lambda j: (0, j)),
            ],
            out_specs=pl.BlockSpec((Bp, tn), lambda j: (0, j)),
        ),
        compiler_params=pltpu.CompilerParams(
            dimension_semantics=("parallel",)),
    )(avg_bf, w_t_bf, b2d)

    return out[:B, :V]


def reference_forward(x, embedding_table, linear_w, linear_b):
    emb = jnp.take(embedding_table, x, axis=0)
    avg = jnp.mean(emb, axis=1)
    return avg @ linear_w.T + linear_b


if __name__ == "__main__":
    # Small shapes consistent with the module (embed_dim=300 exercises the
    # pad-to-304 path; vocab 512 gives a clean multi-tile vocab axis).
    VOCAB = 512          # vocab_size
    EMBED = 300          # embed_dim (module default)
    BATCH = 8
    CONTEXT = 4          # context window length (dim=1 of x)

    key = jax.random.PRNGKey(0)
    k_emb, k_w, k_b, k_x = jax.random.split(key, 4)

    embedding_table = jax.random.normal(k_emb, (VOCAB, EMBED), jnp.float32)
    linear_w = jax.random.normal(k_w, (VOCAB, EMBED), jnp.float32) * 0.05
    linear_b = jax.random.normal(k_b, (VOCAB,), jnp.float32) * 0.05

    x = jax.random.randint(k_x, (BATCH, CONTEXT), 0, VOCAB, jnp.int32)

    # Init-time preparation (cached across forward calls in real use).
    prepared = prepare_cbow_params(linear_w, linear_b)

    out = cbow_forward(x, embedding_table, prepared)
    out = jax.block_until_ready(out)

    ref = reference_forward(x, embedding_table, linear_w, linear_b)
    assert out.shape == (BATCH, VOCAB)
    # bf16 MXU operands (f32 accumulate) -> loosened tolerance vs f32 reference.
    assert jnp.allclose(out, ref, atol=2e-2, rtol=2e-2), "mismatch vs reference"

    print("KERNEL_OK")
</pallas_src>

<mosaic_0001>
module attributes {stable_mosaic.version = 11 : i64} {
  func.func @cbow_kernel(%arg0: i32, %arg1: memref<16x304xbf16, #tpu.memory_space<vmem>>, %arg2: memref<304x512xbf16, #tpu.memory_space<vmem>>, %arg3: memref<1x512xf32, #tpu.memory_space<vmem>>, %arg4: memref<16x512xf32, #tpu.memory_space<vmem>>) attributes {dimension_semantics = [#tpu.dimension_semantics<parallel>], iteration_bounds = array<i64: 1>, scalar_prefetch = 0 : i64, scratch_operands = 0 : i64, tpu.core_type = #tpu.core_type<tc>, window_params = [{pipeline_mode = #tpu.pipeline_mode<synchronous>, transform_indices = @transform_0, window_bounds = array<i64: 16, 304>}, {transform_indices = @transform_1, window_bounds = array<i64: 304, 512>}, {transform_indices = @transform_2, window_bounds = array<i64: 1, 512>}, {transform_indices = @transform_3, window_bounds = array<i64: 16, 512>}]} {
    %c0 = arith.constant 0 : index
    %c0_0 = arith.constant 0 : index
    %0 = vector.load %arg1[%c0, %c0_0] : memref<16x304xbf16, #tpu.memory_space<vmem>>, vector<16x304xbf16>
    %c0_1 = arith.constant 0 : index
    %c0_2 = arith.constant 0 : index
    %1 = vector.load %arg2[%c0_1, %c0_2] : memref<304x512xbf16, #tpu.memory_space<vmem>>, vector<304x512xbf16>
    %cst = arith.constant dense<0.000000e+00> : vector<16x512xf32>
    %2 = tpu.matmul %0, %1, %cst {dimension_numbers = #tpu.dot_dimension_numbers<[1], [0], [0], [1], [0, 0, 1, 1], [], []>} : vector<16x304xbf16>, vector<304x512xbf16>, vector<16x512xf32> -> vector<16x512xf32>
    %c0_3 = arith.constant 0 : index
    %c0_4 = arith.constant 0 : index
    %3 = vector.load %arg3[%c0_3, %c0_4] : memref<1x512xf32, #tpu.memory_space<vmem>>, vector<1x512xf32>
    %4 = vector.broadcast %3 : vector<1x512xf32> to vector<16x512xf32>
    %5 = arith.addf %2, %4 : vector<16x512xf32>
    %c0_5 = arith.constant 0 : index
    %c0_6 = arith.constant 0 : index
    %6 = vector.load %arg4[%c0_5, %c0_6] : memref<16x512xf32, #tpu.memory_space<vmem>>, vector<16x512xf32>
    tpu.vector_store %arg4[%c0_5, %c0_6], %5 {strides = array<i32>} : memref<16x512xf32, #tpu.memory_space<vmem>>, vector<16x512xf32>,
    return
  }
  func.func @transform_0(%arg0: i32) -> (i32, i32) {
    %c0_i32 = arith.constant 0 : i32
    %c0_i32_0 = arith.constant 0 : i32
    %c0_i32_1 = arith.constant 0 : i32
    return %c0_i32, %c0_i32_0 : i32, i32
  }
  func.func @transform_1(%arg0: i32) -> (i32, i32) {
    %c0_i32 = arith.constant 0 : i32
    %c0_i32_0 = arith.constant 0 : i32
    return %c0_i32, %arg0 : i32, i32
  }
  func.func @transform_2(%arg0: i32) -> (i32, i32) {
    %c0_i32 = arith.constant 0 : i32
    %c0_i32_0 = arith.constant 0 : i32
    return %c0_i32, %arg0 : i32, i32
  }
  func.func @transform_3(%arg0: i32) -> (i32, i32) {
    %c0_i32 = arith.constant 0 : i32
    %c0_i32_0 = arith.constant 0 : i32
    return %c0_i32, %arg0 : i32, i32
  }
}

</mosaic_0001>

<bundles_post_ra>
// kernel: tpu_custom_call.1
= control target key start
LH: loop header
LB: loop body
LE: loop exit
PB: predicated region body
PF: predicated region fallthrough
CT: control target
= control target key end

     0   :  { %8 = vsyncpa [#allocation3], 0  ;;  %s1101_s0 = inlined_call_operand.hbm [shape: bf16[16,304], index: 0, kind: input, shape index: {}]   ;;  %s1102_s1 = inlined_call_operand.hbm [shape: bf16[304,512], index: 1, kind: input, shape index: {}]   ;;  %s1103_s2 = inlined_call_operand.hbm [shape: f32[1,512], index: 2, kind: input, shape index: {}]   ;;  %s1104_s3 = inlined_call_operand.hbm [shape: f32[16,512], index: 3, kind: output, shape index: {}]  }
   0x1   :  { %9 = vsyncpa [#allocation6], 0 }
   0x2   :  { %10 = vsyncpa [#allocation4], 0  ;;  %s1050_s12 = smov [#allocation5]  }
   0x3   :  { %s28_s13 = sshll.u32 %s1050_s12, 4  ;;  %s29_s13 = int_to_ptr.vmem [resolvable:$true] %s28_s13 }
   0x4   :  { %s972_s14 = scalar_lea.vmem %s29_s13, 9728  ;;  %p977_p1 = scmp.lt.s32.totalorder %s29_s13, %s29_s13 }
   0x5   :  { %p973_p0 = scmp.ne.s32.totalorder %s29_s13, %s972_s14  ;;  %p978_p2 = scmp.lt.s32.totalorder %s972_s14, %s972_s14 }
   0x7   :  { %p979_p3 = por %p978_p2, %p977_p1 }
   0x9   :  { %p980_p4 = pnand %p979_p3, %p973_p0 }
   0xb   :  { %983 = shalt.err (!%p980_p4)
}
   0xc   :  { %s1051_s15 = smov 256   ;;  %s1052_s16 = smov 16  }
   0xd   :  { %34 = dma.hbm_to_vmem [thread:$0]  %s1102_s1, 9728, %s29_s13, [#allocation6], %s1051_s15, %s1051_s15, %s1052_s16  }
   0xe   :  { %s1053_s19 = smov [#allocation2]  }
   0xf   :  { %s16_s20 = sshll.u32 %s1053_s19, 4  ;;  %s17_s20 = int_to_ptr.vmem [resolvable:$true] %s16_s20 }
  0x10   :  { %s992_s21 = scalar_lea.vmem %s17_s20, 384  ;;  %p997_p6 = scmp.lt.s32.totalorder %s17_s20, %s17_s20 }
  0x11   :  { %p993_p5 = scmp.ne.s32.totalorder %s17_s20, %s992_s21  ;;  %p998_p7 = scmp.lt.s32.totalorder %s992_s21, %s992_s21 }
  0x13   :  { %p999_p8 = por %p998_p7, %p997_p6 }
  0x15   :  { %p1000_p9 = pnand %p999_p8, %p993_p5 }
  0x17   :  { %1003 = shalt.err (!%p1000_p9)
}
  0x18   :  { %s1054_s22 = smov 192   ;;  %s1055_s23 = smov 12  }
  0x19   :  { %22 = dma.hbm_to_vmem [thread:$0]  %s1101_s0, 384, %s17_s20, [#allocation3], %s1054_s22, %s1054_s22, %s1055_s23  }
  0x1a   :  { %s1056_s26 = smov [#allocation7]  }
  0x1b   :  { %s41_s27 = sshll.u32 %s1056_s26, 4  ;;  %s42_s27 = int_to_ptr.vmem [resolvable:$true] %s41_s27 }
  0x1c   :  { %s1012_s1 = scalar_lea.vmem %s42_s27, 64  ;;  %p1017_p11 = scmp.lt.s32.totalorder %s42_s27, %s42_s27 }
  0x1d   :  { %p1013_p10 = scmp.ne.s32.totalorder %s42_s27, %s1012_s1  ;;  %p1018_p12 = scmp.lt.s32.totalorder %s1012_s1, %s1012_s1 }
  0x1f   :  { %p1019_p13 = por %p1018_p12, %p1017_p11 }
  0x21   :  { %p1020_p0 = pnand %p1019_p13, %p1013_p10 }
  0x23   :  { %1023 = shalt.err (!%p1020_p0)
}
  0x24   :  { %44 = dma.hbm_to_vmem [thread:$0]  %s1103_s2, 64, %s42_s27, [#allocation6]  }
  0x25   :  { %1044 = dma.done.wait [#allocation3], 384  }
  0x26   :  { %1045 = vsyncadd [#allocation3], 4294966912 }
  0x27   :  { %1046 = dma.done.wait [#allocation6], 9792  }
  0x28   :  { %1047 = vsyncadd [#allocation6], 4294957504  ;;  %v1057_v0 = vmov 0   ;;  %v846_v1 = vld [vmem:[#allocation5 + $0xe4] ss:$16 sps:$4 sm:$0xff]   ;;  %vm552_vm0 = vcmask 392192  }
  0x29   :  { %631 = vmatprep.mubr.bf16.mxu1 %v1057_v0  ;;  %v848_v2 = vld [vmem:[#allocation5 + $0x244] ss:$16 sps:$4 sm:$0xff]   ;;  %556 = vmatprep.subr.bf16.mxu0 %v846_v1  ;;  %v850_v3 = vld [vmem:[#allocation5 + $0xe0] ss:$16 sps:$4 sm:$0xff]   ;;  %v867_v15 = vld [vmem:[#allocation5 + $0xe8] ss:$16 sps:$4 sm:$0xff]  }
  0x2a   :  { %v851_v4 = vld [vmem:[#allocation5 + $0x240] ss:$16 sps:$4 sm:$0xff]   ;;  %609 = vmatprep.subr.bf16.mxu1 %v848_v2  ;;  %v852_v5 = vld [vmem:[#allocation5 + $0xc4] ss:$16 sps:$4 sm:$0xff]   ;;  %557 = vmatpush1.bf16.msra.mxu0 %v850_v3  ;;  %v869_v16 = vld [vmem:[#allocation5 + $0xec] ss:$16 sps:$4 sm:$0xff]  }
  0x2b   :  { %610 = vmatpush1.bf16.msra.mxu1 %v851_v4  ;;  %v854_v6 = vld [vmem:[#allocation5 + $0x224] ss:$16 sps:$4 sm:$0xff]   ;;  %v856_v7 = vld [vmem:[#allocation5 + $0xc0] ss:$16 sps:$4 sm:$0xff]   ;;  %558 = vmatprep.subr.bf16.mxu0 %v852_v5  ;;  %v875_v19 = vld [vmem:[#allocation5 + $0xcc] ss:$16 sps:$4 sm:$0xff]  }
  0x2c   :  { %v857_v8 = vld [vmem:[#allocation5 + $0x220] ss:$16 sps:$4 sm:$0xff]   ;;  %611 = vmatprep.subr.bf16.mxu1 %v854_v6  ;;  %v858_v9 = vld [vmem:[#allocation5 + $0xa4] ss:$16 sps:$4 sm:$0xff]   ;;  %v873_v20 = vld [vmem:[#allocation5 + $0xc8] ss:$16 sps:$4 sm:$0xff]  }
  0x2d   :  { %v860_v10 = vld [vmem:[#allocation5 + $0x204] ss:$16 sps:$4 sm:$0xff]   ;;  %v862_v11 = vld [vmem:[#allocation5 + $0xa0] ss:$16 sps:$4 sm:$0xff]   ;;  %v881_v23 = vld [vmem:[#allocation5 + $0xac] ss:$16 sps:$4 sm:$0xff]  }
  0x2e   :  { %559 = vmatpush1.bf16.msra.mxu0 %v856_v7  ;;  %v863_v12 = vld [vmem:[#allocation5 + $0x200] ss:$16 sps:$4 sm:$0xff]   ;;  %v864_v13 = vld [vmem:[#allocation5 + $0x84] ss:$16 sps:$4 sm:$0xff]   ;;  %v879_v24 = vld [vmem:[#allocation5 + $0xa8] ss:$16 sps:$4 sm:$0xff]  }
  0x2f   :  { %612 = vmatpush1.bf16.msra.mxu1 %v857_v8  ;;  %560 = vmatprep.subr.bf16.mxu0 %v858_v9  ;;  %v1091_v14 = vld [vmem:[#allocation2 + $0x8] ss:$12 sps:$4 sm:$0xff]   ;;  %v871_v18 = vld [vmem:[#allocation5 + $0x64] ss:$16 sps:$4 sm:$0xff]   ;;  %v885_v28 = vld [vmem:[#allocation5 + $0x88] ss:$16 sps:$4 sm:$0xff]  }
  0x30   :  { %613 = vmatprep.subr.bf16.mxu1 %v860_v10  ;;  %v870_v17 = vld [vmem:[#allocation5 + $0x80] ss:$16 sps:$4 sm:$0xff]   ;;  %v877_v22 = vld [vmem:[#allocation5 + $0x44] ss:$16 sps:$4 sm:$0xff]   ;;  %v887_v27 = vld [vmem:[#allocation5 + $0x8c] ss:$16 sps:$4 sm:$0xff]  }
  0x31   :  { %v876_v21 = vld [vmem:[#allocation5 + $0x60] ss:$16 sps:$4 sm:$0xff]   ;;  %v883_v26 = vld [vmem:[#allocation5 + $0x24] ss:$16 sps:$4 sm:$0xff]   ;;  %v893_v31 = vld [vmem:[#allocation5 + $0x6c] ss:$16 sps:$4 sm:$0xff]  }
  0x32   :  { %561 = vmatpush1.bf16.msra.mxu0 %v862_v11  ;;  %v882_v25 = vld [vmem:[#allocation5 + $0x40] ss:$16 sps:$4 sm:$0xff]   ;;  %v889_v30 = vld [vmem:[#allocation5 + $0x4] ss:$16 sps:$4 sm:$0xff]   ;;  %v891_v32 = vld [vmem:[#allocation5 + $0x68] ss:$16 sps:$4 sm:$0xff]  }
  0x33   :  { %614 = vmatpush1.bf16.msra.mxu1 %v863_v12  ;;  %562 = vmatprep.subr.bf16.mxu0 %v864_v13  ;;  %v888_v29 = vld [vmem:[#allocation5 + $0x20] ss:$16 sps:$4 sm:$0xff]   ;;  %v895_v34 = vld [vmem:[#allocation5 + $0x1e4] ss:$16 sps:$4 sm:$0xff]   ;;  %v899_v35 = vld [vmem:[#allocation5 + $0x4c] ss:$16 sps:$4 sm:$0xff]  }
  0x34   :  { %642 = vmatprep.subr.bf16.mxu1 %v869_v16  ;;  %v894_v33 = vld [vmem:[#allocation5] ss:$16 sps:$4 sm:$0xff]   ;;  %v897_v36 = vld [vmem:[#allocation5 + $0x48] ss:$16 sps:$4 sm:$0xff]   ;;  %v901_v38 = vld [vmem:[#allocation5 + $0x1c4] ss:$16 sps:$4 sm:$0xff]  }
  0x35   :  { %v900_v37 = vld [vmem:[#allocation5 + $0x1e0] ss:$16 sps:$4 sm:$0xff]   ;;  %v905_v39 = vld [vmem:[#allocation5 + $0x2c] ss:$16 sps:$4 sm:$0xff]   ;;  %v903_v40 = vld [vmem:[#allocation5 + $0x28] ss:$16 sps:$4 sm:$0xff]  }
  0x36   :  { %833 = vmatmul.mubr.msk.bf16.vlgmr.msra.gmra.mxu1 %vm552_vm0, %v1091_v14  ;;  %563 = vmatpush1.bf16.msra.mxu0 %v870_v17  ;;  %v906_v41 = vld [vmem:[#allocation5 + $0x1c0] ss:$16 sps:$4 sm:$0xff]   ;;  %v907_v42 = vld [vmem:[#allocation5 + $0x1a4] ss:$16 sps:$4 sm:$0xff]   ;;  %v911_v43 = vld [vmem:[#allocation5 + $0xc] ss:$16 sps:$4 sm:$0xff]  }
  0x37   :  { %643 = vmatpush1.bf16.msra.mxu1 %v867_v15  ;;  %564 = vmatprep.subr.bf16.mxu0 %v871_v18  ;;  %v909_v44 = vld [vmem:[#allocation5 + $0x8] ss:$16 sps:$4 sm:$0xff]   ;;  %v912_v45 = vld [vmem:[#allocation5 + $0x1a0] ss:$16 sps:$4 sm:$0xff]   ;;  %v913_v46 = vld [vmem:[#allocation5 + $0x184] ss:$16 sps:$4 sm:$0xff]   ;;  %v137_v18 = vlaneseq }
  0x38   :  { %644 = vmatprep.subr.bf16.mxu1 %v875_v19  ;;  %v917_v47 = vld [vmem:[#allocation5 + $0x1ec] ss:$16 sps:$4 sm:$0xff]   ;;  %v915_v48 = vld [vmem:[#allocation5 + $0x1e8] ss:$16 sps:$4 sm:$0xff]   ;;  %v918_v49 = vld [vmem:[#allocation5 + $0x180] ss:$16 sps:$4 sm:$0xff]  }
  0x39   :  { %v919_v50 = vld [vmem:[#allocation5 + $0x164] ss:$16 sps:$4 sm:$0xff]   ;;  %v945_v51 = vld [vmem:[#allocation2 + $0x4] ss:$12 sps:$4 sm:$0xff]   ;;  %v924_v54 = vld [vmem:[#allocation5 + $0x160] ss:$16 sps:$4 sm:$0xff]  }
  0x3a   :  { %565 = vmatpush1.bf16.msra.mxu0 %v876_v21  ;;  %v923_v52 = vld [vmem:[#allocation5 + $0x1cc] ss:$16 sps:$4 sm:$0xff]   ;;  %588 = vmatprep.mubr.bf16.mxu0 %v945_v51  ;;  %v921_v53 = vld [vmem:[#allocation5 + $0x1c8] ss:$16 sps:$4 sm:$0xff]   ;;  %v925_v55 = vld [vmem:[#allocation5 + $0x144] ss:$16 sps:$4 sm:$0xff]  }
  0x3b   :  { %645 = vmatpush1.bf16.msra.mxu1 %v873_v20  ;;  %566 = vmatprep.subr.bf16.mxu0 %v877_v22  ;;  %v929_v56 = vld [vmem:[#allocation5 + $0x1ac] ss:$16 sps:$4 sm:$0xff]   ;;  %v927_v57 = vld [vmem:[#allocation5 + $0x1a8] ss:$16 sps:$4 sm:$0xff]   ;;  %v930_v58 = vld [vmem:[#allocation5 + $0x140] ss:$16 sps:$4 sm:$0xff]  }
  0x3c   :  { %646 = vmatprep.subr.bf16.mxu1 %v881_v23  ;;  %674 = vmatprep.mubr.bf16.mxu1 %v945_v51  ;;  %v931_v59 = vld [vmem:[#allocation5 + $0x124] ss:$16 sps:$4 sm:$0xff]   ;;  %v935_v60 = vld [vmem:[#allocation5 + $0x18c] ss:$16 sps:$4 sm:$0xff]   ;;  %v933_v61 = vld [vmem:[#allocation5 + $0x188] ss:$16 sps:$4 sm:$0xff]  }
  0x3d   :  { %v936_v62 = vld [vmem:[#allocation5 + $0x120] ss:$16 sps:$4 sm:$0xff]   ;;  %v937_v63 = vld [vmem:[#allocation5 + $0x104] ss:$16 sps:$4 sm:$0xff]   ;;  %v941_v1 = vld [vmem:[#allocation5 + $0x16c] ss:$16 sps:$4 sm:$0xff]  }
  0x3e   :  { %567 = vmatpush1.bf16.msra.mxu0 %v882_v25  ;;  %v939_v2 = vld [vmem:[#allocation5 + $0x168] ss:$16 sps:$4 sm:$0xff]   ;;  %v942_v3 = vld [vmem:[#allocation5 + $0x100] ss:$16 sps:$4 sm:$0xff]   ;;  %v948_v4 = vld [vmem:[#allocation5 + $0x14c] ss:$16 sps:$4 sm:$0xff]  }
  0x3f   :  { %647 = vmatpush1.bf16.msra.mxu1 %v879_v24  ;;  %568 = vmatprep.subr.bf16.mxu0 %v883_v26  ;;  %v951_v5 = vld [vmem:[#allocation5 + $0x24c] ss:$16 sps:$4 sm:$0xff]   ;;  %v943_v6 = vld [vmem:[#allocation2] ss:$12 sps:$4 sm:$0xff]   ;;  %v138_v19 = vshrl.u32 %v137_v18, 7  ;;  %s1058_s0 = smov [#allocation8]  }
  0x40   :  { %648 = vmatprep.subr.bf16.mxu1 %v887_v27  ;;  %v946_v7 = vld [vmem:[#allocation5 + $0x148] ss:$16 sps:$4 sm:$0xff]   ;;  %v954_v9 = vld [vmem:[#allocation5 + $0x12c] ss:$16 sps:$4 sm:$0xff]   ;;  %v135_v21 = vld [vmem:[#allocation7] sm:$0xf] }
  0x41   :  { %v949_v8 = vld [vmem:[#allocation5 + $0x248] ss:$16 sps:$4 sm:$0xff]   ;;  %v957_v10 = vld [vmem:[#allocation5 + $0x22c] ss:$16 sps:$4 sm:$0xff]   ;;  %v139_v20 = vsub.s32 0, %v138_v19  ;;  %v143_v22 = vsub.s32 1, %v138_v19 }
  0x42   :  { %569 = vmatpush1.bf16.msra.mxu0 %v888_v29  ;;  %v952_v11 = vld [vmem:[#allocation5 + $0x128] ss:$16 sps:$4 sm:$0xff]   ;;  %v960_v13 = vld [vmem:[#allocation5 + $0x10c] ss:$16 sps:$4 sm:$0xff]   ;;  %s741_s2 = sshll.u32 %s1058_s0, 4  ;;  %s742_s2 = int_to_ptr.vmem [resolvable:$true] %s741_s2 }
  0x43   :  { %649 = vmatpush1.bf16.msra.mxu1 %v885_v28  ;;  %570 = vmatprep.subr.bf16.mxu0 %v889_v30  ;;  %v955_v12 = vld [vmem:[#allocation5 + $0x228] ss:$16 sps:$4 sm:$0xff]   ;;  %v963_v15 = vld [vmem:[#allocation5 + $0x20c] ss:$16 sps:$4 sm:$0xff]   ;;  %v140_v24 = vrot.slane %v135_v21, %v139_v20  ;;  %s1024_s30 = scalar_lea.vmem %s742_s2, 1024  ;;  %p1029_p2 = scmp.lt.s32.totalorder %s742_s2, %s742_s2 }
  0x44   :  { %650 = vmatprep.subr.bf16.mxu1 %v893_v31  ;;  %v958_v16 = vld [vmem:[#allocation5 + $0x108] ss:$16 sps:$4 sm:$0xff]   ;;  %p1025_p1 = scmp.ne.s32.totalorder %s742_s2, %s1024_s30  ;;  %p1030_p3 = scmp.lt.s32.totalorder %s1024_s30, %s1024_s30 }
  0x45   :  { %v961_v17 = vld [vmem:[#allocation5 + $0x208] ss:$16 sps:$4 sm:$0xff]  }
  0x46   :  { %571 = vmatpush1.bf16.msra.mxu0 %v894_v33  ;;  %p1031_p4 = por %p1030_p3, %p1029_p2 }
  0x47   :  { %651 = vmatpush1.bf16.msra.mxu1 %v891_v32  ;;  %572 = vmatprep.subr.bf16.mxu0 %v895_v34 }
  0x48   :  { %652 = vmatprep.subr.bf16.mxu1 %v899_v35  ;;  %p1032_p5 = pnand %p1031_p4, %p1025_p1 }
  0x4a   :  { %573 = vmatpush2.bf16.msra.mxu0 %v900_v37 }
  0x4b   :  { %653 = vmatpush1.bf16.msra.mxu1 %v897_v36  ;;  %574 = vmatprep.subr.bf16.mxu0 %v901_v38  ;;  %v151_v38 = vsub.s32 3, %v138_v19 }
  0x4c   :  { %654 = vmatprep.subr.bf16.mxu1 %v905_v39 }
  0x4e   :  { %575 = vmatpush2.bf16.msra.mxu0 %v906_v41 }
  0x4f   :  { %655 = vmatpush1.bf16.msra.mxu1 %v903_v40  ;;  %576 = vmatprep.subr.bf16.mxu0 %v907_v42  ;;  %v152_v42 = vrot.slane %v135_v21, %v151_v38 }
  0x50   :  { %656 = vmatprep.subr.bf16.mxu1 %v911_v43 }
  0x52   :  { %577 = vmatpush2.bf16.msra.mxu0 %v912_v45 }
  0x53   :  { %657 = vmatpush1.bf16.msra.mxu1 %v909_v44  ;;  %578 = vmatprep.subr.bf16.mxu0 %v913_v46 }
  0x54   :  { %658 = vmatprep.subr.bf16.mxu1 %v917_v47 }
  0x56   :  { %579 = vmatpush2.bf16.msra.mxu0 %v918_v49 }
  0x57   :  { %659 = vmatpush2.bf16.msra.mxu1 %v915_v48  ;;  %580 = vmatprep.subr.bf16.mxu0 %v919_v50 }
  0x58   :  { %660 = vmatprep.subr.bf16.mxu1 %v923_v52 }
  0x5a   :  { %581 = vmatpush2.bf16.msra.mxu0 %v924_v54 }
  0x5b   :  { %661 = vmatpush2.bf16.msra.mxu1 %v921_v53  ;;  %582 = vmatprep.subr.bf16.mxu0 %v925_v55 }
  0x5c   :  { %662 = vmatprep.subr.bf16.mxu1 %v929_v56 }
  0x5e   :  { %583 = vmatpush2.bf16.msra.mxu0 %v930_v58 }
  0x5f   :  { %663 = vmatpush2.bf16.msra.mxu1 %v927_v57  ;;  %584 = vmatprep.subr.bf16.mxu0 %v931_v59 }
  0x60   :  { %664 = vmatprep.subr.bf16.mxu1 %v935_v60 }
  0x62   :  { %585 = vmatpush2.bf16.msra.mxu0 %v936_v62 }
  0x63   :  { %665 = vmatpush2.bf16.msra.mxu1 %v933_v61  ;;  %586 = vmatprep.subr.bf16.mxu0 %v937_v63 }
  0x64   :  { %666 = vmatprep.subr.bf16.mxu1 %v941_v1 }
  0x66   :  { %587 = vmatpush2.bf16.msra.mxu0 %v942_v3 }
  0x67   :  { %667 = vmatpush2.bf16.msra.mxu1 %v939_v2  ;;  %695 = vmatprep.subr.bf16.mxu0 %v951_v5 }
  0x68   :  { %668 = vmatprep.subr.bf16.mxu1 %v948_v4 }
  0x69   :  { %589 = vmatmul.mubr.bf16.vlgmr.msra.gmra.mxu0 %v943_v6 }
  0x6a   :  { %696 = vmatpush1.bf16.msra.mxu0 %v949_v8  ;;  %717 = vmatprep.mubr.bf16.mxu0 %v1057_v0  ;;  %v144_v0 = vrot.slane %v135_v21, %v143_v22 }
  0x6b   :  { %669 = vmatpush2.bf16.msra.mxu1 %v946_v7  ;;  %697 = vmatprep.subr.bf16.mxu0 %v957_v10 }
  0x6c   :  { %670 = vmatprep.subr.bf16.mxu1 %v954_v9 }
  0x6e   :  { %698 = vmatpush1.bf16.msra.mxu0 %v955_v12 }
  0x6f   :  { %671 = vmatpush2.bf16.msra.mxu1 %v952_v11  ;;  %699 = vmatprep.subr.bf16.mxu0 %v963_v15 }
  0x70   :  { %672 = vmatprep.subr.bf16.mxu1 %v960_v13 }
  0x72   :  { %700 = vmatpush1.bf16.msra.mxu0 %v961_v17 }
  0x73   :  { %673 = vmatpush2.bf16.msra.mxu1 %v958_v16 }
  0x75   :  { %834 = vmatmul.mubr.msk.bf16.vlgmr.msra.gmra.mxu0 %vm552_vm0, %v1091_v14  ;;  %v147_v14 = vsub.s32 2, %v138_v19 }
  0x76   :  { %675 = vmatmul.mubr.bf16.vlgmr.msra.gmra.mxu1 %v943_v6 }
  0x77   :  { %v148_v41 = vrot.slane %v135_v21, %v147_v14 }
  0xf6   :  { %v633_v23 = vpop.f32.mrf.mxu1 }
  0xf8   :  { %v635_v25 = vpop.f32.mrf.mxu1 }
  0xfa   :  { %v637_v31 = vpop.f32.mrf.mxu1 }
  0xfc   :  { %v639_v39 = vpop.f32.mrf.mxu1 }
 0x129   :  { %v590_v26 = vpop.f32.mrf.mxu0 }
 0x12a   :  { %v591_v27 = vadd.f32 %v590_v26, %v140_v24 }
 0x12b   :  { %v592_v28 = vpop.f32.mrf.mxu0 }
 0x12c   :  { %v634_v29 = vadd.f32 %v633_v23, %v591_v27  ;;  %v593_v30 = vadd.f32 %v592_v28, %v144_v0 }
 0x12d   :  { %v594_v32 = vpop.f32.mrf.mxu0 }
 0x12e   :  { %728 = vst [vmem:[#allocation8] sm:$0xff] %v634_v29  ;;  %v636_v33 = vadd.f32 %v635_v25, %v593_v30  ;;  %v595_v34 = vadd.f32 %v594_v32, %v140_v24 }
 0x12f   :  { %v596_v35 = vpop.f32.mrf.mxu0 }
 0x130   :  { %729 = vst [vmem:[#allocation8 + $0x8] sm:$0xff] %v636_v33  ;;  %v638_v36 = vadd.f32 %v637_v31, %v595_v34  ;;  %v597_v37 = vadd.f32 %v596_v35, %v144_v0 }
 0x132   :  { %732 = vst [vmem:[#allocation8 + $0x20] sm:$0xff] %v638_v36  ;;  %v640_v40 = vadd.f32 %v639_v39, %v597_v37 }
 0x134   :  { %733 = vst [vmem:[#allocation8 + $0x28] sm:$0xff] %v640_v40 }
 0x135   :  { %v719_v44 = vpop.f32.mrf.mxu0 }
 0x136   :  { %v676_v43 = vpop.f32.mrf.mxu1 }
 0x137   :  { %v677_v45 = vadd.f32 %v676_v43, %v148_v41  ;;  %v721_v47 = vpop.f32.mrf.mxu0 }
 0x138   :  { %v678_v46 = vpop.f32.mrf.mxu1 }
 0x139   :  { %v720_v48 = vadd.f32 %v719_v44, %v677_v45  ;;  %v679_v49 = vadd.f32 %v678_v46, %v152_v42  ;;  %v723_v51 = vpop.f32.mrf.mxu0 }
 0x13a   :  { %v680_v50 = vpop.f32.mrf.mxu1 }
 0x13b   :  { %730 = vst [vmem:[#allocation8 + $0x10] sm:$0xff] %v720_v48  ;;  %v722_v52 = vadd.f32 %v721_v47, %v679_v49  ;;  %v681_v53 = vadd.f32 %v680_v50, %v148_v41  ;;  %v725_v57 = vpop.f32.mrf.mxu0 }
 0x13c   :  { %v682_v54 = vpop.f32.mrf.mxu1 }
 0x13d   :  { %731 = vst [vmem:[#allocation8 + $0x18] sm:$0xff] %v722_v52  ;;  %v724_v55 = vadd.f32 %v723_v51, %v681_v53  ;;  %v683_v56 = vadd.f32 %v682_v54, %v152_v42 }
 0x13f   :  { %734 = vst [vmem:[#allocation8 + $0x30] sm:$0xff] %v724_v55  ;;  %v726_v58 = vadd.f32 %v725_v57, %v683_v56 }
 0x141   :  { %735 = vst [vmem:[#allocation8 + $0x38] sm:$0xff] %v726_v58 }
 0x142   :  { %1035 = shalt.err (!%p1032_p5)
}
 0x143   :  { %s1059_s4 = smov 512   ;;  %s1060_s5 = smov 32  }
 0x144   :  { %747 = dma.vmem_to_hbm [thread:$0]  %s742_s2, 1024, %s1104_s3, [#allocation4], %s1059_s4, %s1059_s4, %s1060_s5  }
 0x145   :  { %1048 = dma.done.wait [#allocation4], 1024  }
 0x146   :  { %1049 = vsyncadd [#allocation4], 4294966272 }
 0x147   :  { %751 = vsyncpa [#allocation3], 1 }
 0x148   :  { %752 = vsyncpa [#allocation6], 1 }
 0x149   :  { %753 = vsyncpa [#allocation4], 1 }

</bundles_post_ra>
